<compile_context>
chip_gen: v7x
topology: tpu7x:2x2x1
jax: 0.10.0
libtpu: 0.0.40
codegen_flags: <defaults>
</compile_context>

<pallas_src>
from functools import partial

import jax
import jax.numpy as jnp
from jax.experimental import pallas as pl
from jax.experimental.pallas import tpu as pltpu


_VMEM = pltpu.MemorySpace.VMEM


def _vspec():
    return pl.BlockSpec(memory_space=_VMEM)


def _run(kernel, out_shape, *inputs, scratch_shapes=()):
    """Single-invocation (no grid) pallas_call with whole-array VMEM refs."""
    if isinstance(out_shape, (tuple, list)):
        out_specs = tuple(_vspec() for _ in out_shape)
        out_shape = tuple(out_shape)
    else:
        out_specs = _vspec()
    return pl.pallas_call(
        kernel,
        out_shape=out_shape,
        in_specs=[_vspec() for _ in inputs],
        out_specs=out_specs,
        scratch_shapes=list(scratch_shapes),
    )(*inputs)


def _bdot(a, b):
    # bf16 MXU operands, f32 accumulation.
    return jnp.dot(a.astype(jnp.bfloat16), b.astype(jnp.bfloat16),
                   preferred_element_type=jnp.float32)


def _sigmoid(v):
    # Numerically stable; tanh runs on the EUP slot (keeps the VPU divide off the
    # serial GRU chain).
    return 0.5 * (jnp.tanh(0.5 * v) + 1.0)


# ----------------------------------------------------------------------------
# Kernels
# ----------------------------------------------------------------------------
def _dnnbase_kernel(u_ref, v_ref, wb_ref, o_ref):
    # sum(linear(uid_emb) * iid_emb, axis=-1);  wb = [W ; b] packed row-wise.
    D = u_ref.shape[1]
    y = jnp.dot(u_ref[...], wb_ref[0:D, :],
                preferred_element_type=jnp.float32) + wb_ref[D:D + 1, :]
    o_ref[...] = jnp.sum(y * v_ref[...], axis=1, keepdims=True)


def _pre_kernel(u_ref, v_ref, x_ref, m_ref, wk_ref, wd2b_ref, swrep_ref, ttile_ref,
                o_ref):
    # Fused test_pre/train_pre: MetaNet + (src.linear folded with t_rep) + bmm + dot.
    L, B, D = x_ref.shape
    M = wk_ref.shape[1] - D
    x = x_ref[...]
    xf = x.reshape(L * B, D)

    wk1 = wk_ref[0:D, 0:D]
    wd1 = wk_ref[0:D, D:D + M]
    bk1 = wk_ref[D:D + 1, 0:D]
    bd1 = wk_ref[D:D + 1, D:D + M]
    wk2 = wk_ref[D + 1:D + 2, 0:D].reshape(1, 1, D)

    # MetaNet event attention (softmax over the sequence, masked positions -> -1e8)
    hq = jnp.maximum(jnp.dot(xf, wk1, preferred_element_type=jnp.float32) + bk1, 0.0)
    ek = jnp.sum(hq.reshape(L, B, D) * wk2, axis=2, keepdims=True)        # (L,B,1)
    t = ek - m_ref[...] * 1e8
    t = t - jnp.max(t, axis=0, keepdims=True)
    e = jnp.exp(t)
    att = e / jnp.sum(e, axis=0, keepdims=True)
    his = jnp.sum(att * x, axis=0)                                        # (B, D)

    # MetaNet decoder -> flattened (D, D) mapping per row
    d = jnp.maximum(jnp.dot(his, wd1, preferred_element_type=jnp.float32) + bd1, 0.0)
    wd2 = wd2b_ref[0:M, :]
    bd2 = wd2b_ref[M:M + 1, :]
    ptu = _bdot(d, wd2) + bd2                                             # (B, D*D)

    # out[b] = sum_ij ue[b,i] * ptu[b,i*D+j] * iid[b,j] as plain 2-D GEMM expansions.
    # swrep = [src.W @ t_rep ; src.b @ t_rep]  (src.linear folded with the repeat matrix)
    ue_rep = jnp.dot(u_ref[...], swrep_ref[0:D, :],
                     preferred_element_type=jnp.float32) + swrep_ref[D:D + 1, :]
    iid_tile = jnp.dot(v_ref[...], ttile_ref[...], preferred_element_type=jnp.float32)
    o_ref[...] = jnp.sum(ptu * ue_rep * iid_tile, axis=1, keepdims=True)


def _meta_kernel(x_ref, us_ref, v_ref,
                 wih_ref, whh_ref, bgru_ref, bn1_ref, wlfc_ref,
                 watt_ref, misc_ref,
                 gw1_ref, gw2_ref, gw3_ref, gb_ref,
                 tsr_ref, ttile_ref,
                 o_ref,
                 xproj_s, hs_s, gen_s):
    # Whole train_meta/test_meta compute path in ONE kernel:
    #   GRU + BatchNorm1d(L) + ReLU + (l2_reg@fc) + muAtt + BatchNorm1d(D)
    #   + Generator(user_fea) + Generator(src.linear(uid)) + bilinear head.
    L, B, D = x_ref.shape
    GP = whh_ref.shape[0]            # per-gate padded width (128, lane aligned)
    HR = hs_s.shape[2]               # real GRU hidden size (50)
    GOUT = wlfc_ref.shape[1]         # GRU fc output size (== D == 10)
    M = (watt_ref.shape[1] - D) // 2
    DD = gw3_ref.shape[1]
    NG = gw2_ref.shape[0]            # generator width (128)

    x = x_ref[...]
    xf = x.reshape(L * B, D)

    # ---- GRU: one fused input-projection GEMM for all 3 gates and all timesteps ----
    b_ih = bgru_ref[0:1, :]
    b_hh = bgru_ref[1:2, :]
    xproj_s[...] = (_bdot(xf, wih_ref[...]) + b_ih).reshape(L, B, 3 * GP)

    whh = whh_ref[...]
    h = jnp.zeros((B, GP), jnp.float32)
    for step in range(L):            # static L -> fully unrolled recurrence
        hp = jnp.dot(h, whh, preferred_element_type=jnp.float32) + b_hh
        xp = xproj_s[step]
        r = _sigmoid(xp[:, 0:GP] + hp[:, 0:GP])
        z = _sigmoid(xp[:, GP:2 * GP] + hp[:, GP:2 * GP])
        n = jnp.tanh(xp[:, 2 * GP:3 * GP] + r * hp[:, 2 * GP:3 * GP])
        h = (1.0 - z) * n + z * h
        hs_s[step] = h[:, 0:HR]      # keep only the real hidden width for BN stats

    # ---- BatchNorm1d(L) (training-mode batch stats) + ReLU + (l2_reg @ fc) ----
    out = hs_s[...]                                           # (L, B, HR)
    inv_bh = 1.0 / (B * HR)
    mean = jnp.sum(jnp.sum(out, axis=2, keepdims=True), axis=1, keepdims=True) * inv_bh
    cent = out - mean
    var = jnp.sum(jnp.sum(cent * cent, axis=2, keepdims=True), axis=1, keepdims=True) * inv_bh
    out1 = cent * jax.lax.rsqrt(var + 1e-5) * bn1_ref[:, :, 0:1] + bn1_ref[:, :, 1:2]
    # TODO(synk): nn.Dropout(p=0.5) is stochastic in torch train mode; modelled as identity.
    out3 = jnp.maximum(out1, 0.0)
    b_fc = misc_ref[2:3, 0:GOUT]
    sf = jnp.dot(out3.reshape(L * B, HR), wlfc_ref[...],
                 preferred_element_type=jnp.float32) + b_fc   # (L*B, GOUT == D)

    # ---- muAtt ----
    wa1 = watt_ref[:, 0:M]
    wa2 = watt_ref[:, M:2 * M]
    wfc2 = watt_ref[:, 2 * M:2 * M + D]
    ba1 = misc_ref[0:1, 0:M]
    ba2 = misc_ref[1:2, 0:M]
    wa3 = misc_ref[3:4, 0:M].reshape(1, 1, M)
    ba3 = misc_ref[4:5, 0:1].reshape(1, 1, 1)
    bfc2 = misc_ref[5:6, 0:D]
    bn2g = misc_ref[6:7, 0:D]
    bn2b = misc_ref[7:8, 0:D]

    a1 = jnp.tanh(jnp.dot(xf, wa1, preferred_element_type=jnp.float32) + ba1)
    a2 = jnp.tanh(jnp.dot(sf, wa2, preferred_element_type=jnp.float32) + ba2)
    a = jnp.tanh(a1 + a2)
    sc = jnp.sum(a.reshape(L, B, M) * wa3, axis=2, keepdims=True) + ba3   # (L, B, 1)
    sc = sc - jnp.max(sc, axis=0, keepdims=True)
    e = jnp.exp(sc)
    w = e / jnp.sum(e, axis=0, keepdims=True)                             # softmax over L
    fused = w * x + (1.0 - w) * sf.reshape(L, B, D)
    outp = _bdot(fused.reshape(L * B, D), wfc2) + bfc2
    o1 = jnp.sum(outp.reshape(L, B, D), axis=0)                           # (B, D)
    mu = jnp.mean(o1, axis=0, keepdims=True)
    vr = jnp.mean((o1 - mu) ** 2, axis=0, keepdims=True)
    user_fea = (o1 - mu) * jax.lax.rsqrt(vr + 1e-5) * bn2g + bn2b         # (B, D)

    # ---- Generator x2 (stacked rows) + bilinear head ----
    # gw1 = [w1 | src.W @ w1];  gb rows = [b1, src.b@w1+b1, b2, b3(pad), alpha(pad)]
    slope = gb_ref[4:5, 0:1]
    gen_s[0:B, :] = jnp.dot(user_fea, gw1_ref[:, 0:NG],
                            preferred_element_type=jnp.float32) + gb_ref[0:1, :]
    gen_s[B:2 * B, :] = jnp.dot(us_ref[...], gw1_ref[:, NG:2 * NG],
                                preferred_element_type=jnp.float32) + gb_ref[1:2, :]
    g = gen_s[...]
    g = jnp.where(g >= 0.0, g, slope * g)                                 # shared PReLU
    g = _bdot(g, gw2_ref[...]) + gb_ref[2:3, :]
    g = jnp.where(g >= 0.0, g, slope * g)
    g = _bdot(g, gw3_ref[...]) + gb_ref[3:4, 0:DD]                        # (2B, D*D)
    g_user = g[0:B, :]
    g_src = g[B:2 * B, :]
    # a3 = row-sums of view(g_src, D, D); tsr = t_sum @ t_rep precomputed
    a3rep = jnp.dot(g_src, tsr_ref[...], preferred_element_type=jnp.float32)    # (B, D*D)
    iid_tile = jnp.dot(v_ref[...], ttile_ref[...], preferred_element_type=jnp.float32)
    o_ref[...] = jnp.sum(g_user * a3rep * iid_tile, axis=1, keepdims=True)


def _map_train_kernel(us_ref, ut_ref, swm_ref, tw_ref, so_ref, to_ref):
    # swm = [src.W @ mapping ; src.b @ mapping]   (mapping has no bias)
    # tw  = [tgt.W ; tgt.b]
    D = us_ref.shape[1]
    so_ref[...] = (jnp.dot(us_ref[...], swm_ref[0:D, :],
                           preferred_element_type=jnp.float32) + swm_ref[D:D + 1, :])
    to_ref[...] = (jnp.dot(ut_ref[...], tw_ref[0:D, :],
                           preferred_element_type=jnp.float32) + tw_ref[D:D + 1, :])


def _map_test_kernel(u_ref, v_ref, swm_ref, o_ref):
    D = u_ref.shape[1]
    y = (jnp.dot(u_ref[...], swm_ref[0:D, :],
                 preferred_element_type=jnp.float32) + swm_ref[D:D + 1, :])
    o_ref[...] = jnp.sum(y * v_ref[...], axis=1, keepdims=True)


# ----------------------------------------------------------------------------
# Parameters (deterministic synthetic init — shapes follow the torch __init__)
# ----------------------------------------------------------------------------
def init_params(key, uid_all, iid_all, emb_dim, meta_dim):
    keys = iter(jax.random.split(key, 64))

    def nrm(shape, scale=0.1):
        return (scale * jax.random.normal(next(keys), shape)).astype(jnp.float32)

    def dnn_base():
        return dict(uid=nrm((uid_all, emb_dim)), iid=nrm((iid_all + 1, emb_dim)),
                    w=nrm((emb_dim, emb_dim)), b=nrm((emb_dim,)))

    H, GOUT, L = 50, 10, 20    # GRUModel(input=10, hidden=50, out=10); BatchNorm1d(20)
    DD = emb_dim * emb_dim
    return dict(
        src=dnn_base(), tgt=dnn_base(), aug=dnn_base(),
        meta=dict(wk1=nrm((emb_dim, emb_dim)), bk1=nrm((emb_dim,)),
                  wk2=nrm((emb_dim, 1)),
                  wd1=nrm((emb_dim, meta_dim)), bd1=nrm((meta_dim,)),
                  wd2=nrm((meta_dim, DD)), bd2=nrm((DD,))),
        gru=dict(w_ih=nrm((emb_dim, 3 * H)), b_ih=nrm((3 * H,)),
                 w_hh=nrm((H, 3 * H)), b_hh=nrm((3 * H,)),
                 bn_gamma=jnp.ones((L,), jnp.float32),
                 bn_beta=jnp.zeros((L,), jnp.float32),
                 w_l2=nrm((H, H)), w_fc=nrm((H, GOUT)), b_fc=nrm((GOUT,))),
        mtt=dict(wa1=nrm((emb_dim, meta_dim)), ba1=nrm((meta_dim,)),
                 wa2=nrm((emb_dim, meta_dim)), ba2=nrm((meta_dim,)),
                 wa3=nrm((meta_dim, 1)), ba3=nrm((1,)),
                 wfc=nrm((emb_dim, emb_dim)), bfc=nrm((emb_dim,)),
                 bn_gamma=jnp.ones((emb_dim,), jnp.float32),
                 bn_beta=jnp.zeros((emb_dim,), jnp.float32)),
        gen=dict(w1=nrm((emb_dim, 128)), b1=nrm((128,)),
                 w2=nrm((128, 128)), b2=nrm((128,)),
                 w3=nrm((128, DD)), b3=nrm((DD,)),
                 alpha=jnp.full((1,), 0.25, jnp.float32)),
        mapping=dict(w=nrm((emb_dim, emb_dim))),
        # NOTE: self.Encoder is never used in DNNBasedModel.forward -> not materialized.
    )


# ----------------------------------------------------------------------------
# Full model
# ----------------------------------------------------------------------------
class DNNBasedModelPallas:
    GP = 128     # per-gate padded width (vreg-lane aligned GRU gate slices)
    H = 50       # GRU hidden size
    L = 20       # history length (BatchNorm1d(20))
    GOUT = 10    # GRU fc output size

    def __init__(self, uid_all, iid_all, num_fields, emb_dim, meta_dim, key):
        assert emb_dim == 10, "GRUModel(input_size=10) / muAtt BatchNorm1d(10) require emb_dim=10"
        self.num_fields = num_fields
        self.emb_dim = emb_dim
        self.meta_dim = meta_dim
        self.params = init_params(key, uid_all, iid_all, emb_dim, meta_dim)
        self.packed = self._pack(self.params)
        self._build_stage_fns()

    # --- one-time weight re-packing / algebraic folds -------------------------------
    def _pack(self, p):
        D, M, H, GP, L = self.emb_dim, self.meta_dim, self.H, self.GP, self.L
        DD = D * D
        f32 = jnp.float32
        eye = jnp.eye(D, dtype=f32)
        t_tile = jnp.tile(eye, (1, D))           # (D, DD): [j, i*D+j] = 1
        t_rep = jnp.repeat(eye, D, axis=1)       # (D, DD): [i, i*D+j] = 1
        t_sum = t_tile.T                         # (DD, D): sums over the row index i

        def pad_gates(w):
            # (rows, 3H) -> (rows, 3*GP), each gate zero-padded to GP columns.
            blocks = [jnp.pad(w[:, g * H:(g + 1) * H], ((0, 0), (0, GP - H)))
                      for g in range(3)]
            return jnp.concatenate(blocks, axis=1)

        def wb(w, b):
            return jnp.concatenate([w, jnp.reshape(b, (1, -1))], axis=0)

        def row(v, width):
            v = jnp.ravel(jnp.asarray(v, f32))
            return jnp.pad(v, (0, width - v.shape[0]))

        gp, mp, gen, meta = p['gru'], p['mtt'], p['gen'], p['meta']
        src, tgt, aug, mapw = p['src'], p['tgt'], p['aug'], p['mapping']['w']

        # GRU gate packing (padded to lane-aligned GP-wide blocks)
        wih = pad_gates(gp['w_ih'])                                        # (D, 3GP)
        whh = jnp.pad(pad_gates(gp['w_hh']), ((0, GP - H), (0, 0)))        # (GP, 3GP)
        bgru = jnp.concatenate([pad_gates(gp['b_ih'].reshape(1, -1)),
                                pad_gates(gp['b_hh'].reshape(1, -1))], axis=0)  # (2, 3GP)
        bn1 = jnp.stack([gp['bn_gamma'], gp['bn_beta']], axis=-1).reshape(L, 1, 2)
        wlfc = gp['w_l2'] @ gp['w_fc']                                     # l2_reg @ fc fold
        watt = jnp.concatenate([mp['wa1'], mp['wa2'], mp['wfc']], axis=1)  # (D, 2M+D)
        misc = jnp.stack([row(mp['ba1'], D), row(mp['ba2'], D), row(gp['b_fc'], D),
                          row(mp['wa3'], D), row(mp['ba3'], D), row(mp['bfc'], D),
                          row(mp['bn_gamma'], D), row(mp['bn_beta'], D)], axis=0)  # (8, D)

        # Generator packing; src.linear folded into the second generator's first layer.
        w1_src = src['w'] @ gen['w1']
        b1_src = src['b'] @ gen['w1'] + gen['b1']
        gw1 = jnp.concatenate([gen['w1'], w1_src], axis=1)                 # (D, 256)
        gb = jnp.stack([row(gen['b1'], 128), row(b1_src, 128), row(gen['b2'], 128),
                        row(gen['b3'], 128), row(gen['alpha'], 128)], axis=0)   # (5, 128)
        tsr = t_sum @ t_rep                                                # (DD, DD)

        # test_pre / train_pre packing
        wk_pack = jnp.concatenate([
            jnp.concatenate([meta['wk1'], meta['wd1']], axis=1),
            jnp.concatenate([meta['bk1'].reshape(1, -1),
                             meta['bd1'].reshape(1, -1)], axis=1),
            row(meta['wk2'], D + M).reshape(1, -1)], axis=0)               # (D+2, D+M)
        wd2b = wb(meta['wd2'], meta['bd2'])                                # (M+1, DD)
        swrep = wb(src['w'] @ t_rep, src['b'] @ t_rep)                     # (D+1, DD)

        # mapping stages (mapping has no bias)
        swm = wb(src['w'] @ mapw, src['b'] @ mapw)                         # (D+1, D)
        twb = wb(tgt['w'], tgt['b'])                                       # (D+1, D)

        return dict(
            src_uid=src['uid'], src_iid=src['iid'], src_wb=wb(src['w'], src['b']),
            tgt_uid=tgt['uid'], tgt_iid=tgt['iid'], tgt_wb=wb(tgt['w'], tgt['b']),
            aug_uid=aug['uid'], aug_iid=aug['iid'], aug_wb=wb(aug['w'], aug['b']),
            wih=wih, whh=whh, bgru=bgru, bn1=bn1, wlfc=wlfc, watt=watt, misc=misc,
            gw1=gw1, gw2=gen['w2'], gw3=gen['w3'], gb=gb,
            tsr=tsr, t_tile=t_tile,
            wk_pack=wk_pack, wd2b=wd2b, swrep=swrep,
            swm=swm, twb=twb,
        )

    # --- per-stage jitted forward functions ------------------------------------------
    def _build_stage_fns(self):
        pk = self.packed
        L, GP, H, D = self.L, self.GP, self.H, self.emb_dim

        def base_fwd(uid_tab, iid_tab, wbm, x):
            u = jnp.take(uid_tab, x[:, 0], axis=0)
            v = jnp.take(iid_tab, x[:, 1], axis=0)
            out = _run(_dnnbase_kernel,
                       jax.ShapeDtypeStruct((x.shape[0], 1), jnp.float32),
                       u, v, wbm)
            return out[:, 0]

        def pre_fwd(x):
            B = x.shape[0]
            u = jnp.take(pk['src_uid'], x[:, 0], axis=0)
            v = jnp.take(pk['tgt_iid'], x[:, 1], axis=0)
            seq_t = x[:, 2:].T                                       # (L, B) time-major
            x_t = jnp.take(pk['src_iid'], seq_t, axis=0)             # (L, B, D)
            m_t = (seq_t == 0).astype(jnp.float32)[:, :, None]       # (L, B, 1)
            out = _run(_pre_kernel, jax.ShapeDtypeStruct((B, 1), jnp.float32),
                       u, v, x_t, m_t,
                       pk['wk_pack'], pk['wd2b'], pk['swrep'], pk['t_tile'])
            return out[:, 0]

        def meta_fwd(x):
            B = x.shape[0]
            u = jnp.take(pk['src_uid'], x[:, 0], axis=0)
            v = jnp.take(pk['tgt_iid'], x[:, 1], axis=0)
            x_t = jnp.take(pk['src_iid'], x[:, 2:].T, axis=0)        # (L, B, D)
            out = _run(
                _meta_kernel, jax.ShapeDtypeStruct((B, 1), jnp.float32),
                x_t, u, v,
                pk['wih'], pk['whh'], pk['bgru'], pk['bn1'], pk['wlfc'],
                pk['watt'], pk['misc'],
                pk['gw1'], pk['gw2'], pk['gw3'], pk['gb'],
                pk['tsr'], pk['t_tile'],
                scratch_shapes=(pltpu.VMEM((L, B, 3 * GP), jnp.float32),
                                pltpu.VMEM((L, B, H), jnp.float32),
                                pltpu.VMEM((2 * B, 128), jnp.float32)))
            # NOTE: torch returns the SRC uid embedding as uid_emb_tgt in this branch.
            return out[:, 0], u[:, None, :]

        def map_train_fwd(x):
            B = x.shape[0]
            us = jnp.take(pk['src_uid'], x, axis=0)
            ut = jnp.take(pk['tgt_uid'], x, axis=0)
            return _run(_map_train_kernel,
                        (jax.ShapeDtypeStruct((B, D), jnp.float32),
                         jax.ShapeDtypeStruct((B, D), jnp.float32)),
                        us, ut, pk['swm'], pk['twb'])

        def map_test_fwd(x):
            B = x.shape[0]
            u = jnp.take(pk['src_uid'], x[:, 0], axis=0)
            v = jnp.take(pk['tgt_iid'], x[:, 1], axis=0)
            out = _run(_map_test_kernel, jax.ShapeDtypeStruct((B, 1), jnp.float32),
                       u, v, pk['swm'])
            return out[:, 0]

        self._stage_fns = {
            'train_src': jax.jit(partial(base_fwd, pk['src_uid'], pk['src_iid'], pk['src_wb'])),
            'train_tgt': jax.jit(partial(base_fwd, pk['tgt_uid'], pk['tgt_iid'], pk['tgt_wb'])),
            'train_aug': jax.jit(partial(base_fwd, pk['aug_uid'], pk['aug_iid'], pk['aug_wb'])),
            'train_pre': jax.jit(pre_fwd),
            'train_meta': jax.jit(meta_fwd),
            'train_map': jax.jit(map_train_fwd),
            'test_map': jax.jit(map_test_fwd),
        }
        self._stage_fns['test_tgt'] = self._stage_fns['train_tgt']
        self._stage_fns['test_aug'] = self._stage_fns['train_aug']
        self._stage_fns['test_pre'] = self._stage_fns['train_pre']
        self._stage_fns['test_meta'] = self._stage_fns['train_meta']

    def forward(self, x, stage):
        fn = self._stage_fns.get(stage)
        if fn is None:
            raise ValueError(f"unknown stage: {stage}")
        return fn(x)


# ----------------------------------------------------------------------------
if __name__ == "__main__":
    key = jax.random.PRNGKey(0)
    pkey, xkey = jax.random.split(key)

    # emb_dim must be 10 (GRU input_size=10; muAtt BatchNorm1d(10)); history length
    # must be 20 (BatchNorm1d(20)).  B=8 keeps every in-kernel (L,B,*)<->(L*B,*)
    # reshape sublane-aligned (relayout-free).
    uid_all, iid_all, num_fields, emb_dim, meta_dim = 32, 64, 2, 10, 8
    B, L = 8, 20

    model = DNNBasedModelPallas(uid_all, iid_all, num_fields, emb_dim, meta_dim, pkey)

    k1, k2, k3, k4 = jax.random.split(xkey, 4)
    uid = jax.random.randint(k1, (B, 1), 0, uid_all)
    iid = jax.random.randint(k2, (B, 1), 1, iid_all + 1)
    hist = jax.random.randint(k3, (B, L), 0, iid_all + 1)
    hist = jnp.where(jax.random.bernoulli(k4, 0.3, (B, L)), 0, hist)   # zeros -> masked slots
    x = jnp.concatenate([uid, iid, hist], axis=1).astype(jnp.int32)    # (B, 2 + L)

    outs = []
    outs.append(model.forward(x, 'train_src'))
    outs.append(model.forward(x, 'train_tgt'))
    outs.append(model.forward(x, 'train_aug'))
    outs.append(model.forward(x, 'test_pre'))
    meta_out, uid_emb_tgt = model.forward(x, 'train_meta')
    outs += [meta_out, uid_emb_tgt]
    src_emb, tgt_emb = model.forward(x[:, 0], 'train_map')
    outs += [src_emb, tgt_emb]
    outs.append(model.forward(x, 'test_map'))

    for o in outs:
        jax.block_until_ready(o)
    print("KERNEL_OK")
</pallas_src>

<mosaic_0001>
module attributes {stable_mosaic.version = 11 : i64} {
  func.func @_dnnbase_kernel(%arg0: memref<8x10xf32, #tpu.memory_space<vmem>>, %arg1: memref<8x10xf32, #tpu.memory_space<vmem>>, %arg2: memref<11x10xf32, #tpu.memory_space<vmem>>, %arg3: memref<8x1xf32, #tpu.memory_space<vmem>>) attributes {dimension_semantics = [], scalar_prefetch = 0 : i64, scratch_operands = 0 : i64, tpu.core_type = #tpu.core_type<tc>} {
    %c0 = arith.constant 0 : index
    %c0_0 = arith.constant 0 : index
    %0 = vector.load %arg0[%c0, %c0_0] : memref<8x10xf32, #tpu.memory_space<vmem>>, vector<8x10xf32>
    %c0_1 = arith.constant 0 : index
    %c0_2 = arith.constant 0 : index
    %1 = vector.load %arg2[%c0_1, %c0_2] : memref<11x10xf32, #tpu.memory_space<vmem>>, vector<10x10xf32>
    %cst = arith.constant dense<0.000000e+00> : vector<8x10xf32>
    %2 = tpu.matmul %0, %1, %cst {dimension_numbers = #tpu.dot_dimension_numbers<[1], [0], [0], [1], [0, 0, 1, 1], [], []>} : vector<8x10xf32>, vector<10x10xf32>, vector<8x10xf32> -> vector<8x10xf32>
    %c10 = arith.constant 10 : index
    %c0_3 = arith.constant 0 : index
    %3 = vector.load %arg2[%c10, %c0_3] : memref<11x10xf32, #tpu.memory_space<vmem>>, vector<1x10xf32>
    %4 = vector.broadcast %3 : vector<1x10xf32> to vector<8x10xf32>
    %5 = arith.addf %2, %4 : vector<8x10xf32>
    %c0_4 = arith.constant 0 : index
    %c0_5 = arith.constant 0 : index
    %6 = vector.load %arg1[%c0_4, %c0_5] : memref<8x10xf32, #tpu.memory_space<vmem>>, vector<8x10xf32>
    %7 = arith.mulf %5, %6 : vector<8x10xf32>
    %cst_6 = arith.constant dense<0.000000e+00> : vector<8xf32>
    %8 = vector.multi_reduction <add>, %7, %cst_6 [1] : vector<8x10xf32> to vector<8xf32>
    %9 = vector.shape_cast %8 : vector<8xf32> to vector<8x1xf32>
    %c0_7 = arith.constant 0 : index
    %c0_8 = arith.constant 0 : index
    %10 = vector.load %arg3[%c0_7, %c0_8] : memref<8x1xf32, #tpu.memory_space<vmem>>, vector<8x1xf32>
    tpu.vector_store %arg3[%c0_7, %c0_8], %9 {strides = array<i32>} : memref<8x1xf32, #tpu.memory_space<vmem>>, vector<8x1xf32>,
    return
  }
}

</mosaic_0001>

<bundles_post_ra>
// kernel: base_fwd.1
= control target key start
LH: loop header
LB: loop body
LE: loop exit
PB: predicated region body
PF: predicated region fallthrough
CT: control target
= control target key end

     0   :  { %vm26_vm0 = vcmask 1041408   ;;  %v132_v0 = vmov 0.0|0.0   ;;  %vm133_vm1 = vmmov 1   ;;  %vm134_vm3 = vmmov 0   ;;  %s174_s2 = inlined_call_operand.vmem [shape: f32[11,10], index: 2, kind: input, shape index: {}]   ;;  %s175_s0 = inlined_call_operand.vmem [shape: f32[8,10], index: 0, kind: input, shape index: {}]   ;;  %s176_s1 = inlined_call_operand.vmem [shape: f32[8,10], index: 1, kind: input, shape index: {}]   ;;  %s177_s3 = inlined_call_operand.vmem [shape: f32[8,1], index: 3, kind: output, shape index: {}]  }
   0x1   :  { %124 = vmatprep.subr.bf16.mxu0 %v132_v0  ;;  %v15_v1 = vld [vmem:[%s174_s2] sm:$0xff]  ;;  %v16_v2 = vld [vmem:[%s174_s2 + $0x8] sm:$0x3]  ;;  %vm126_vm2 = vmpackc.low %vm26_vm0, %vm133_vm1  ;;  %v135_v4 = vmov 0.0   ;;  %vm22_vm4 = vcmask 80896   ;;  %vm105_vm5 = vcmask 7168  }
   0x2   :  { %v125_v3 = vpack.c.bf16 %v16_v2, %v15_v1  ;;  %121 = vmatprep.mubr.msk.f32.mxu0 %vm134_vm3, %v135_v4  ;;  %v14_v5 = vld [vmem:[%s175_s0] sm:$0xff]  ;;  %v111_v6 = vld [vmem:[%s174_s2 + $0xa] ss:$0 sm:$0xff] }
   0x3   :  { %v100_v8 = vld [vmem:[%s176_s1] sm:$0xff] }
   0x4   :  { %127 = vmatpush3.bf16.msk.msra.mxu0 %vm126_vm2, %v125_v3 }
   0x7   :  { %122 = vmatmul.mubr.msk.f32.vlgmr.msra.gmra.mrb[0].mxu0 %vm22_vm4, %v14_v5 }
  0xda   :  { %v96_v7 = vpop.f32.mrb[0].mxu0 }
  0xdb   :  { %v97_v9 = vadd.f32 %v111_v6, %v96_v7  ;;  %v123_v10 = vpop.f32.mrb[1].mxu0 }
  0xdd   :  { %v101_v11 = vmul.f32 %v100_v8, %v97_v9 }
  0xdf   :  { %v102_v12 = vsel %vm22_vm4, %v101_v11, 0.0 }
  0xe0   :  { %103 = vadd.xlane.f32.xlu0 %v102_v12 }
 0x16d   :  { %v104_v13 = vpop.xlane.xlu0 %103 }
 0x16e   :  { %106 = vst.msk [vmem:[%s177_s3] sm:$0xff] %vm105_vm5, %v104_v13 }

</bundles_post_ra>
